<compile_context>
chip_gen: v5e
topology: v5e:2x2
jax: 0.10.0
libtpu: 0.0.40
codegen_flags: <defaults>
</compile_context>

<pallas_src>
import numpy as np
import jax
import jax.numpy as jnp
from jax.experimental import pallas as pl
from jax.experimental.pallas import tpu as pltpu

# ---- "dataset" constants (synthetic, deterministic) ----
NUM_MOD_CLASSES = 8
NUM_CODE_CLASSES = 16          # code_seq_logits last dim = NUM_CODE_CLASSES + 1

# ---- module hyper-parameters (defaults of MultiTaskLoss.__init__) ----
_MOD_W, _WIDTH_W, _SEQ_W = 0.2, 0.3, 0.5
_TOT = _MOD_W + _WIDTH_W + _SEQ_W
MOD_WEIGHT, WIDTH_WEIGHT, SEQ_WEIGHT = _MOD_W / _TOT, _WIDTH_W / _TOT, _SEQ_W / _TOT
PAD_IDX = 0
LABEL_SMOOTHING = 0.0

# Normalizers folded into the weights (constant folding, no in-kernel log/div).
MOD_COEF = MOD_WEIGHT / np.log(NUM_MOD_CLASSES)
WIDTH_COEF = WIDTH_WEIGHT / 0.04
SEQ_COEF = SEQ_WEIGHT / np.log(NUM_CODE_CLASSES)

# Tokens per block along the flattened B*T axis.  With C=17 the physical VMEM
# footprint of one f32 logits block is tile/8 vregs (= tile*512 B): 4096
# tokens -> 2 MiB logits + 2 MiB labels per buffer, x2 double-buffering
# = 8 MiB, leaving ample headroom for in-kernel f32 temporaries under the
# 32 MiB scoped-VMEM limit set below (safe on v5e / v6e / v7x alike).
SEQ_TILE_TOKENS = 4096


def multi_task_loss(mod_logits, symbol_width_pred, code_seq_logits,
                    mod_labels, symbol_width_labels, code_seq_labels,
                    code_seq_masks, *, seq_tile_tokens=SEQ_TILE_TOKENS):
    """Pallas implementation of MultiTaskLoss.forward."""
    # code_seq_masks is accepted but unused, exactly like the PyTorch forward.
    del code_seq_masks
    B, M = mod_logits.shape
    _, T, C = code_seq_logits.shape
    bt = B * T

    # Dominant tensor: NO transpose, NO pad (feedback #1).  reshape [B,T,C]
    # -> [B*T, C] is a free, layout-preserving metadata change.
    seq_logits2 = code_seq_logits.reshape(bt, C)
    seq_labels2 = code_seq_labels.reshape(bt, 1).astype(jnp.int32)

    if bt <= seq_tile_tokens:
        tile_t = bt                          # single full block (any bt legal)
    else:
        tile_t = max(8, (seq_tile_tokens // 8) * 8)
    n_tiles = -(-bt // tile_t)               # cdiv
    # Leading "parallel" axis: splits token tiles across the two TensorCores
    # on v7x; on 1-TC chips it is just a short serial loop.
    n_par = 2 if n_tiles >= 2 else 1
    n_per_p = -(-n_tiles // n_par)
    max_blk = n_tiles - 1

    mod_labels2 = mod_labels.reshape(B, 1).astype(jnp.int32)
    wp2 = symbol_width_pred.reshape(1, B).astype(jnp.float32)
    wl2 = symbol_width_labels.reshape(1, B).astype(jnp.float32)

    def seq_map(p, i):
        # Clamp so the (at most one) overhang step of the parallel split
        # re-reads the last valid block; its tokens are fully masked in-kernel.
        return (jnp.minimum(p * n_per_p + i, max_blk), 0)

    def kernel(mod_logits_ref, mod_labels_ref, wp_ref, wl_ref,
               sl_ref, slab_ref, out_ref):
        p = pl.program_id(0)
        i = pl.program_id(1)

        @pl.when(i == 0)
        def _init():
            out_ref[...] = jnp.zeros_like(out_ref)

        # ----- masked sequence cross-entropy: partial sums for this tile -----
        sl = sl_ref[...].astype(jnp.float32)                     # [tile, C]
        lab = slab_ref[...]                                      # [tile, 1]
        smax = jnp.max(sl, axis=1, keepdims=True)
        lse = smax + jnp.log(jnp.sum(jnp.exp(sl - smax), axis=1, keepdims=True))
        cls = jax.lax.broadcasted_iota(jnp.int32, sl.shape, 1)
        picked = jnp.sum(jnp.where(cls == lab, sl, 0.0), axis=1, keepdims=True)
        nll = lse - picked                                       # [tile, 1]
        if LABEL_SMOOTHING != 0.0:   # trace-time guard: dead code when == 0
            smooth = lse - jnp.mean(sl, axis=1, keepdims=True)
            per_tok = (1.0 - LABEL_SMOOTHING) * nll + LABEL_SMOOTHING * smooth
        else:
            per_tok = nll

        # Ragged-tail handling in-kernel (no wrapper jnp.pad): tokens whose
        # flat index is >= bt come from an undefined DMA fill, so drop them by
        # global index with a NaN-safe select.
        start = (p * n_per_p + i) * tile_t
        tok = jax.lax.broadcasted_iota(jnp.int32, (tile_t, 1), 0) + start
        active = jnp.logical_and(tok < bt, lab != PAD_IDX)
        nll_part = jnp.sum(jnp.where(active, per_tok, 0.0))
        cnt_part = jnp.sum(jnp.where(active, 1.0, 0.0))

        # Accumulate the two scalars into lanes (0,0)/(0,1) of this core's
        # (8,128) partial-sum output block (full-block vector add).
        row = jax.lax.broadcasted_iota(jnp.int32, (8, 128), 0)
        col = jax.lax.broadcasted_iota(jnp.int32, (8, 128), 1)
        r0 = row == 0
        contrib = jnp.where(jnp.logical_and(r0, col == 0), nll_part, 0.0)
        contrib = jnp.where(jnp.logical_and(r0, col == 1), cnt_part, contrib)
        out_ref[...] += contrib

        # ----- tiny losses (mod CE + width MSE): once, on (p==0, i==0) -----
        @pl.when(jnp.logical_and(p == 0, i == 0))
        def _small():
            ml = mod_logits_ref[...].astype(jnp.float32)          # [B, M]
            mlab = mod_labels_ref[...]                            # [B, 1]
            mmax = jnp.max(ml, axis=1, keepdims=True)
            mlse = mmax + jnp.log(jnp.sum(jnp.exp(ml - mmax), axis=1,
                                          keepdims=True))
            mcls = jax.lax.broadcasted_iota(jnp.int32, ml.shape, 1)
            mpicked = jnp.sum(jnp.where(mcls == mlab, ml, 0.0), axis=1,
                              keepdims=True)
            mod_sum = jnp.sum(mlse - mpicked)                     # wrapper / B
            wsq_sum = jnp.sum((wp_ref[...] - wl_ref[...]) ** 2)   # wrapper / B
            small = jnp.where(jnp.logical_and(r0, col == 2), mod_sum, 0.0)
            small = jnp.where(jnp.logical_and(r0, col == 3), wsq_sum, small)
            out_ref[...] += small

    partials = pl.pallas_call(
        kernel,
        out_shape=jax.ShapeDtypeStruct((n_par * 8, 128), jnp.float32),
        grid_spec=pltpu.PrefetchScalarGridSpec(
            num_scalar_prefetch=0,
            grid=(n_par, n_per_p),
            in_specs=[
                # tiny tensors: constant block index -> fetched once, resident
                pl.BlockSpec((B, M), lambda p, i: (0, 0)),        # mod_logits
                pl.BlockSpec((B, 1), lambda p, i: (0, 0)),        # mod_labels
                pl.BlockSpec((1, B), lambda p, i: (0, 0)),        # width_pred
                pl.BlockSpec((1, B), lambda p, i: (0, 0)),        # width_labels
                # dominant tensor: natural [B*T, C] layout, tiled along tokens
                pl.BlockSpec((tile_t, C), seq_map),               # seq_logits
                pl.BlockSpec((tile_t, 1), seq_map),               # seq_labels
            ],
            # Per-core partial-sum block: disjoint across the parallel axis,
            # revisited (accumulated) across the reduction axis.
            out_specs=pl.BlockSpec((8, 128), lambda p, i: (p, 0)),
        ),
        compiler_params=pltpu.CompilerParams(
            dimension_semantics=("parallel", "arbitrary"),
            vmem_limit_bytes=32 * 1024 * 1024),
    )(mod_logits, mod_labels2, wp2, wl2, seq_logits2, seq_labels2)

    # Trivial scalar epilogue combining the per-core partials (per review:
    # "do the trivial weighted combine ... in the wrapper").
    parts = partials.reshape(n_par, 8, 128)
    nll_tot = jnp.sum(parts[:, 0, 0])
    cnt_tot = jnp.sum(parts[:, 0, 1])
    mod_loss = jnp.sum(parts[:, 0, 2]) / B
    width_loss = jnp.sum(parts[:, 0, 3]) / B
    seq_loss = nll_tot / cnt_tot    # all-PAD -> 0/0 = NaN, like the reference
    return MOD_COEF * mod_loss + WIDTH_COEF * width_loss + SEQ_COEF * seq_loss


def _reference_loss(mod_logits, symbol_width_pred, code_seq_logits,
                    mod_labels, symbol_width_labels, code_seq_labels,
                    code_seq_masks):
    """Pure-JAX reference mirroring torch.nn.functional semantics."""
    del code_seq_masks
    logp_mod = jax.nn.log_softmax(mod_logits.astype(jnp.float32), axis=-1)
    mod_nll = -jnp.take_along_axis(logp_mod, mod_labels[:, None], axis=-1)[:, 0]
    mod_loss = jnp.mean(mod_nll) / np.log(NUM_MOD_CLASSES)

    width_loss = jnp.mean((symbol_width_pred - symbol_width_labels) ** 2) / 0.04

    B, T, C = code_seq_logits.shape
    logits = code_seq_logits.reshape(-1, C).astype(jnp.float32)
    labels = code_seq_labels.reshape(-1)
    logp = jax.nn.log_softmax(logits, axis=-1)
    nll = -jnp.take_along_axis(logp, labels[:, None], axis=-1)[:, 0]
    smooth = -jnp.mean(logp, axis=-1)
    per_tok = (1.0 - LABEL_SMOOTHING) * nll + LABEL_SMOOTHING * smooth
    mask = (labels != PAD_IDX).astype(jnp.float32)
    seq_loss = (jnp.sum(per_tok * mask) / jnp.sum(mask)) / np.log(NUM_CODE_CLASSES)

    return (MOD_WEIGHT * mod_loss + WIDTH_WEIGHT * width_loss
            + SEQ_WEIGHT * seq_loss)


def _make_inputs(key, B, T):
    C = NUM_CODE_CLASSES + 1
    k1, k2, k3, k4, k5, k6 = jax.random.split(key, 6)
    mod_logits = jax.random.normal(k1, (B, NUM_MOD_CLASSES), jnp.float32)
    symbol_width_pred = jax.random.uniform(k2, (B,), jnp.float32)
    code_seq_logits = jax.random.normal(k3, (B, T, C), jnp.float32)
    mod_labels = jax.random.randint(k4, (B,), 0, NUM_MOD_CLASSES, jnp.int32)
    symbol_width_labels = jax.random.uniform(k5, (B,), jnp.float32)
    code_seq_labels = jax.random.randint(k6, (B, T), 0, C, jnp.int32)
    # guarantee at least one non-pad token per batch row
    code_seq_labels = code_seq_labels.at[:, 0].set(1)
    code_seq_masks = (code_seq_labels != PAD_IDX).astype(jnp.float32)
    return (mod_logits, symbol_width_pred, code_seq_logits,
            mod_labels, symbol_width_labels, code_seq_labels, code_seq_masks)


if __name__ == "__main__":
    key = jax.random.PRNGKey(0)
    k_a, k_b = jax.random.split(key)

    # Case A: tiny shapes -> single tile, single grid slot.
    args_a = _make_inputs(k_a, B=4, T=8)
    loss_a = jax.block_until_ready(multi_task_loss(*args_a))
    ref_a = _reference_loss(*args_a)

    # Case B: exercises multi-tile accumulation, the 2-way parallel partials,
    # the ragged tail (bt=180 with tile=64) and the clamped overhang step.
    args_b = _make_inputs(k_b, B=4, T=45)
    loss_b = jax.block_until_ready(multi_task_loss(*args_b, seq_tile_tokens=64))
    ref_b = _reference_loss(*args_b)

    assert np.allclose(np.asarray(loss_a), np.asarray(ref_a),
                       rtol=2e-5, atol=2e-5), \
        f"case A mismatch: pallas={loss_a} ref={ref_a}"
    assert np.allclose(np.asarray(loss_b), np.asarray(ref_b),
                       rtol=2e-5, atol=2e-5), \
        f"case B mismatch: pallas={loss_b} ref={ref_b}"
    print("KERNEL_OK")
</pallas_src>

<mosaic_0001>
module attributes {stable_mosaic.version = 11 : i64} {
  func.func @kernel(%arg0: i32, %arg1: i32, %arg2: memref<4x8xf32, #tpu.memory_space<vmem>>, %arg3: memref<4x1xi32, #tpu.memory_space<vmem>>, %arg4: memref<1x4xf32, #tpu.memory_space<vmem>>, %arg5: memref<1x4xf32, #tpu.memory_space<vmem>>, %arg6: memref<32x17xf32, #tpu.memory_space<vmem>>, %arg7: memref<32x1xi32, #tpu.memory_space<vmem>>, %arg8: memref<8x128xf32, #tpu.memory_space<vmem>>) attributes {dimension_semantics = [#tpu.dimension_semantics<parallel>, #tpu.dimension_semantics<arbitrary>], iteration_bounds = array<i64: 1, 1>, scalar_prefetch = 0 : i64, scratch_operands = 0 : i64, tpu.core_type = #tpu.core_type<tc>, window_params = [{pipeline_mode = #tpu.pipeline_mode<synchronous>, transform_indices = @transform_0, window_bounds = array<i64: 4, 8>}, {pipeline_mode = #tpu.pipeline_mode<synchronous>, transform_indices = @transform_1, window_bounds = array<i64: 4, 1>}, {pipeline_mode = #tpu.pipeline_mode<synchronous>, transform_indices = @transform_2, window_bounds = array<i64: 1, 4>}, {pipeline_mode = #tpu.pipeline_mode<synchronous>, transform_indices = @transform_3, window_bounds = array<i64: 1, 4>}, {transform_indices = @transform_4, window_bounds = array<i64: 32, 17>}, {transform_indices = @transform_5, window_bounds = array<i64: 32, 1>}, {transform_indices = @transform_6, window_bounds = array<i64: 8, 128>}]} {
    %c0_i32 = arith.constant 0 : i32
    %0 = arith.cmpi eq, %arg1, %c0_i32 : i32
    %1 = arith.extui %0 : i1 to i32
    %c0_i32_0 = arith.constant 0 : i32
    %2 = arith.cmpi ne, %1, %c0_i32_0 : i32
    scf.if %2 {
      %cst_25 = arith.constant 0.000000e+00 : f32
      %69 = vector.broadcast %cst_25 : f32 to vector<8x128xf32>
      %c0_26 = arith.constant 0 : index
      %c0_27 = arith.constant 0 : index
      %70 = vector.load %arg8[%c0_26, %c0_27] : memref<8x128xf32, #tpu.memory_space<vmem>>, vector<8x128xf32>
      tpu.vector_store %arg8[%c0_26, %c0_27], %69 {strides = array<i32>} : memref<8x128xf32, #tpu.memory_space<vmem>>, vector<8x128xf32>,
    } else {
    }
    %c0 = arith.constant 0 : index
    %c0_1 = arith.constant 0 : index
    %3 = vector.load %arg6[%c0, %c0_1] : memref<32x17xf32, #tpu.memory_space<vmem>>, vector<32x17xf32>
    %c0_2 = arith.constant 0 : index
    %c0_3 = arith.constant 0 : index
    %4 = vector.load %arg7[%c0_2, %c0_3] : memref<32x1xi32, #tpu.memory_space<vmem>>, vector<32x1xi32>
    %cst = arith.constant dense<0xFF800000> : vector<32xf32>
    %5 = vector.multi_reduction <maximumf>, %3, %cst [1] : vector<32x17xf32> to vector<32xf32>
    %6 = vector.shape_cast %5 : vector<32xf32> to vector<32x1xf32>
    %7 = vector.broadcast %6 : vector<32x1xf32> to vector<32x17xf32>
    %8 = arith.subf %3, %7 : vector<32x17xf32>
    %9 = math.exp %8 : vector<32x17xf32>
    %cst_4 = arith.constant dense<0.000000e+00> : vector<32xf32>
    %10 = vector.multi_reduction <add>, %9, %cst_4 [1] : vector<32x17xf32> to vector<32xf32>
    %11 = vector.shape_cast %10 : vector<32xf32> to vector<32x1xf32>
    %12 = math.log %11 : vector<32x1xf32>
    %13 = arith.addf %6, %12 : vector<32x1xf32>
    %14 = tpu.iota {dimensions = array<i32: 1>} : vector<32x17xi32>
    %15 = vector.broadcast %4 : vector<32x1xi32> to vector<32x17xi32>
    %16 = arith.cmpi eq, %14, %15 : vector<32x17xi32>
    %cst_5 = arith.constant 0.000000e+00 : f32
    %17 = vector.broadcast %cst_5 : f32 to vector<32x17xf32>
    %18 = arith.select %16, %3, %17 : vector<32x17xi1>, vector<32x17xf32>
    %cst_6 = arith.constant dense<0.000000e+00> : vector<32xf32>
    %19 = vector.multi_reduction <add>, %18, %cst_6 [1] : vector<32x17xf32> to vector<32xf32>
    %20 = vector.shape_cast %19 : vector<32xf32> to vector<32x1xf32>
    %21 = arith.subf %13, %20 : vector<32x1xf32>
    %c1_i32 = arith.constant 1 : i32
    %22 = arith.muli %arg0, %c1_i32 : i32
    %23 = arith.addi %22, %arg1 : i32
    %c32_i32 = arith.constant 32 : i32
    %24 = arith.muli %23, %c32_i32 : i32
    %25 = tpu.iota {dimensions = array<i32: 0>} : vector<32x1xi32>
    %26 = vector.broadcast %24 : i32 to vector<32x1xi32>
    %27 = arith.addi %25, %26 : vector<32x1xi32>
    %c32_i32_7 = arith.constant 32 : i32
    %28 = vector.broadcast %c32_i32_7 : i32 to vector<32x1xi32>
    %29 = arith.cmpi slt, %27, %28 : vector<32x1xi32>
    %c0_i32_8 = arith.constant 0 : i32
    %30 = vector.broadcast %c0_i32_8 : i32 to vector<32x1xi32>
    %31 = arith.cmpi ne, %4, %30 : vector<32x1xi32>
    %32 = arith.andi %29, %31 : vector<32x1xi1>
    %cst_9 = arith.constant 0.000000e+00 : f32
    %33 = vector.broadcast %cst_9 : f32 to vector<32x1xf32>
    %34 = arith.select %32, %21, %33 : vector<32x1xi1>, vector<32x1xf32>
    %35 = vector.shape_cast %34 : vector<32x1xf32> to vector<1x32x1xf32>
    %cst_10 = arith.constant dense<0.000000e+00> : vector<1xf32>
    %36 = vector.multi_reduction <add>, %35, %cst_10 [1, 2] : vector<1x32x1xf32> to vector<1xf32>
    %37 = vector.shape_cast %36 : vector<1xf32> to vector<1x1x1xf32>
    %38 = vector.extract %37[0, 0, 0] : f32 from vector<1x1x1xf32>
    %cst_11 = arith.constant 1.000000e+00 : f32
    %cst_12 = arith.constant 0.000000e+00 : f32
    %39 = vector.broadcast %cst_11 : f32 to vector<32x1xf32>
    %40 = vector.broadcast %cst_12 : f32 to vector<32x1xf32>
    %41 = arith.select %32, %39, %40 : vector<32x1xi1>, vector<32x1xf32>
    %42 = vector.shape_cast %41 : vector<32x1xf32> to vector<1x32x1xf32>
    %cst_13 = arith.constant dense<0.000000e+00> : vector<1xf32>
    %43 = vector.multi_reduction <add>, %42, %cst_13 [1, 2] : vector<1x32x1xf32> to vector<1xf32>
    %44 = vector.shape_cast %43 : vector<1xf32> to vector<1x1x1xf32>
    %45 = vector.extract %44[0, 0, 0] : f32 from vector<1x1x1xf32>
    %46 = tpu.iota {dimensions = array<i32: 0>} : vector<8x128xi32>
    %47 = tpu.iota {dimensions = array<i32: 1>} : vector<8x128xi32>
    %c0_i32_14 = arith.constant 0 : i32
    %48 = vector.broadcast %c0_i32_14 : i32 to vector<8x128xi32>
    %49 = arith.cmpi eq, %46, %48 : vector<8x128xi32>
    %c0_i32_15 = arith.constant 0 : i32
    %50 = vector.broadcast %c0_i32_15 : i32 to vector<8x128xi32>
    %51 = arith.cmpi eq, %47, %50 : vector<8x128xi32>
    %52 = arith.andi %49, %51 : vector<8x128xi1>
    %cst_16 = arith.constant 0.000000e+00 : f32
    %53 = vector.broadcast %38 : f32 to vector<8x128xf32>
    %54 = vector.broadcast %cst_16 : f32 to vector<8x128xf32>
    %55 = arith.select %52, %53, %54 : vector<8x128xi1>, vector<8x128xf32>
    %c1_i32_17 = arith.constant 1 : i32
    %56 = vector.broadcast %c1_i32_17 : i32 to vector<8x128xi32>
    %57 = arith.cmpi eq, %47, %56 : vector<8x128xi32>
    %58 = arith.andi %49, %57 : vector<8x128xi1>
    %59 = vector.broadcast %45 : f32 to vector<8x128xf32>
    %60 = arith.select %58, %59, %55 : vector<8x128xi1>, vector<8x128xf32>
    %c0_18 = arith.constant 0 : index
    %c0_19 = arith.constant 0 : index
    %61 = vector.load %arg8[%c0_18, %c0_19] : memref<8x128xf32, #tpu.memory_space<vmem>>, vector<8x128xf32>
    %62 = arith.addf %61, %60 : vector<8x128xf32>
    %c0_20 = arith.constant 0 : index
    %c0_21 = arith.constant 0 : index
    %63 = vector.load %arg8[%c0_20, %c0_21] : memref<8x128xf32, #tpu.memory_space<vmem>>, vector<8x128xf32>
    tpu.vector_store %arg8[%c0_20, %c0_21], %62 {strides = array<i32>} : memref<8x128xf32, #tpu.memory_space<vmem>>, vector<8x128xf32>,
    %c0_i32_22 = arith.constant 0 : i32
    %64 = arith.cmpi eq, %arg0, %c0_i32_22 : i32
    %c0_i32_23 = arith.constant 0 : i32
    %65 = arith.cmpi eq, %arg1, %c0_i32_23 : i32
    %66 = arith.andi %64, %65 : i1
    %67 = arith.extui %66 : i1 to i32
    %c0_i32_24 = arith.constant 0 : i32
    %68 = arith.cmpi ne, %67, %c0_i32_24 : i32
    scf.if %68 {
      %c0_25 = arith.constant 0 : index
      %c0_26 = arith.constant 0 : index
      %69 = vector.load %arg2[%c0_25, %c0_26] : memref<4x8xf32, #tpu.memory_space<vmem>>, vector<4x8xf32>
      %c0_27 = arith.constant 0 : index
      %c0_28 = arith.constant 0 : index
      %70 = vector.load %arg3[%c0_27, %c0_28] : memref<4x1xi32, #tpu.memory_space<vmem>>, vector<4x1xi32>
      %cst_29 = arith.constant dense<0xFF800000> : vector<4xf32>
      %71 = vector.multi_reduction <maximumf>, %69, %cst_29 [1] : vector<4x8xf32> to vector<4xf32>
      %72 = vector.shape_cast %71 : vector<4xf32> to vector<4x1xf32>
      %73 = vector.broadcast %72 : vector<4x1xf32> to vector<4x8xf32>
      %74 = arith.subf %69, %73 : vector<4x8xf32>
      %75 = math.exp %74 : vector<4x8xf32>
      %cst_30 = arith.constant dense<0.000000e+00> : vector<4xf32>
      %76 = vector.multi_reduction <add>, %75, %cst_30 [1] : vector<4x8xf32> to vector<4xf32>
      %77 = vector.shape_cast %76 : vector<4xf32> to vector<4x1xf32>
      %78 = math.log %77 : vector<4x1xf32>
      %79 = arith.addf %72, %78 : vector<4x1xf32>
      %80 = tpu.iota {dimensions = array<i32: 1>} : vector<4x8xi32>
      %81 = vector.broadcast %70 : vector<4x1xi32> to vector<4x8xi32>
      %82 = arith.cmpi eq, %80, %81 : vector<4x8xi32>
      %cst_31 = arith.constant 0.000000e+00 : f32
      %83 = vector.broadcast %cst_31 : f32 to vector<4x8xf32>
      %84 = arith.select %82, %69, %83 : vector<4x8xi1>, vector<4x8xf32>
      %cst_32 = arith.constant dense<0.000000e+00> : vector<4xf32>
      %85 = vector.multi_reduction <add>, %84, %cst_32 [1] : vector<4x8xf32> to vector<4xf32>
      %86 = vector.shape_cast %85 : vector<4xf32> to vector<4x1xf32>
      %87 = arith.subf %79, %86 : vector<4x1xf32>
      %88 = vector.shape_cast %87 : vector<4x1xf32> to vector<1x4x1xf32>
      %cst_33 = arith.constant dense<0.000000e+00> : vector<1xf32>
      %89 = vector.multi_reduction <add>, %88, %cst_33 [1, 2] : vector<1x4x1xf32> to vector<1xf32>
      %90 = vector.shape_cast %89 : vector<1xf32> to vector<1x1x1xf32>
      %91 = vector.extract %90[0, 0, 0] : f32 from vector<1x1x1xf32>
      %c0_34 = arith.constant 0 : index
      %c0_35 = arith.constant 0 : index
      %92 = vector.load %arg4[%c0_34, %c0_35] : memref<1x4xf32, #tpu.memory_space<vmem>>, vector<1x4xf32>
      %c0_36 = arith.constant 0 : index
      %c0_37 = arith.constant 0 : index
      %93 = vector.load %arg5[%c0_36, %c0_37] : memref<1x4xf32, #tpu.memory_space<vmem>>, vector<1x4xf32>
      %94 = arith.subf %92, %93 : vector<1x4xf32>
      %95 = arith.mulf %94, %94 : vector<1x4xf32>
      %96 = vector.shape_cast %95 : vector<1x4xf32> to vector<1x1x4xf32>
      %cst_38 = arith.constant dense<0.000000e+00> : vector<1xf32>
      %97 = vector.multi_reduction <add>, %96, %cst_38 [1, 2] : vector<1x1x4xf32> to vector<1xf32>
      %98 = vector.shape_cast %97 : vector<1xf32> to vector<1x1x1xf32>
      %99 = vector.extract %98[0, 0, 0] : f32 from vector<1x1x1xf32>
      %c2_i32 = arith.constant 2 : i32
      %100 = vector.broadcast %c2_i32 : i32 to vector<8x128xi32>
      %101 = arith.cmpi eq, %47, %100 : vector<8x128xi32>
      %102 = arith.andi %49, %101 : vector<8x128xi1>
      %cst_39 = arith.constant 0.000000e+00 : f32
      %103 = vector.broadcast %91 : f32 to vector<8x128xf32>
      %104 = vector.broadcast %cst_39 : f32 to vector<8x128xf32>
      %105 = arith.select %102, %103, %104 : vector<8x128xi1>, vector<8x128xf32>
      %c3_i32 = arith.constant 3 : i32
      %106 = vector.broadcast %c3_i32 : i32 to vector<8x128xi32>
      %107 = arith.cmpi eq, %47, %106 : vector<8x128xi32>
      %108 = arith.andi %49, %107 : vector<8x128xi1>
      %109 = vector.broadcast %99 : f32 to vector<8x128xf32>
      %110 = arith.select %108, %109, %105 : vector<8x128xi1>, vector<8x128xf32>
      %c0_40 = arith.constant 0 : index
      %c0_41 = arith.constant 0 : index
      %111 = vector.load %arg8[%c0_40, %c0_41] : memref<8x128xf32, #tpu.memory_space<vmem>>, vector<8x128xf32>
      %112 = arith.addf %111, %110 : vector<8x128xf32>
      %c0_42 = arith.constant 0 : index
      %c0_43 = arith.constant 0 : index
      %113 = vector.load %arg8[%c0_42, %c0_43] : memref<8x128xf32, #tpu.memory_space<vmem>>, vector<8x128xf32>
      tpu.vector_store %arg8[%c0_42, %c0_43], %112 {strides = array<i32>} : memref<8x128xf32, #tpu.memory_space<vmem>>, vector<8x128xf32>,
    } else {
    }
    return
  }
  func.func @transform_0(%arg0: i32, %arg1: i32) -> (i32, i32) {
    %c0_i32 = arith.constant 0 : i32
    %c0_i32_0 = arith.constant 0 : i32
    %c0_i32_1 = arith.constant 0 : i32
    return %c0_i32, %c0_i32_0 : i32, i32
  }
  func.func @transform_1(%arg0: i32, %arg1: i32) -> (i32, i32) {
    %c0_i32 = arith.constant 0 : i32
    %c0_i32_0 = arith.constant 0 : i32
    %c0_i32_1 = arith.constant 0 : i32
    return %c0_i32, %c0_i32_0 : i32, i32
  }
  func.func @transform_2(%arg0: i32, %arg1: i32) -> (i32, i32) {
    %c0_i32 = arith.constant 0 : i32
    %c0_i32_0 = arith.constant 0 : i32
    %c0_i32_1 = arith.constant 0 : i32
    return %c0_i32, %c0_i32_0 : i32, i32
  }
  func.func @transform_3(%arg0: i32, %arg1: i32) -> (i32, i32) {
    %c0_i32 = arith.constant 0 : i32
    %c0_i32_0 = arith.constant 0 : i32
    %c0_i32_1 = arith.constant 0 : i32
    return %c0_i32, %c0_i32_0 : i32, i32
  }
  func.func @transform_4(%arg0: i32, %arg1: i32) -> (i32, i32) {
    %c1_i32 = arith.constant 1 : i32
    %0 = arith.muli %arg0, %c1_i32 : i32
    %1 = arith.addi %0, %arg1 : i32
    %c0_i32 = arith.constant 0 : i32
    %2 = arith.minsi %1, %c0_i32 : i32
    %c0_i32_0 = arith.constant 0 : i32
    %c0_i32_1 = arith.constant 0 : i32
    return %2, %c0_i32_0 : i32, i32
  }
  func.func @transform_5(%arg0: i32, %arg1: i32) -> (i32, i32) {
    %c1_i32 = arith.constant 1 : i32
    %0 = arith.muli %arg0, %c1_i32 : i32
    %1 = arith.addi %0, %arg1 : i32
    %c0_i32 = arith.constant 0 : i32
    %2 = arith.minsi %1, %c0_i32 : i32
    %c0_i32_0 = arith.constant 0 : i32
    %c0_i32_1 = arith.constant 0 : i32
    return %2, %c0_i32_0 : i32, i32
  }
  func.func @transform_6(%arg0: i32, %arg1: i32) -> (i32, i32) {
    %c0_i32 = arith.constant 0 : i32
    %c0_i32_0 = arith.constant 0 : i32
    return %arg0, %c0_i32 : i32, i32
  }
}

</mosaic_0001>

<bundles_post_ra>
// kernel: tpu_custom_call.1
= control target key start
LH: loop header
LB: loop body
LE: loop exit
PB: predicated region body
PF: predicated region fallthrough
CT: control target
= control target key end

     0   :  { %vm101_vm0 = vcmask 138240   ;;  %vm272_vm1 = vcmask 60416   ;;  %v419_v6 = vmov 0   ;;  %s608_s0 = inlined_call_operand.vmem [shape: f32[4,8], index: 0, kind: input, shape index: {}]   ;;  %s609_s1 = inlined_call_operand.vmem [shape: s32[4,1], index: 1, kind: input, shape index: {}]   ;;  %s610_s2 = inlined_call_operand.vmem [shape: f32[1,4], index: 2, kind: input, shape index: {}]   ;;  %s611_s3 = inlined_call_operand.vmem [shape: f32[1,4], index: 3, kind: input, shape index: {}]   ;;  %s612_s4 = inlined_call_operand.vmem [shape: f32[32,17], index: 4, kind: input, shape index: {}]   ;;  %s613_s5 = inlined_call_operand.vmem [shape: s32[32,1], index: 5, kind: input, shape index: {}]   ;;  %s614_s6 = inlined_call_operand.hbm [shape: f32[8,128], index: 6, kind: output, shape index: {}]  }
   0x1   :  { %v460_v0 = vld [vmem:[%s612_s4 + $0x10] sm:$0xff]  ;;  %v465_v1 = vld [vmem:[%s612_s4] sm:$0xff]  ;;  %371 = vset.pattern.permute.xlu0 %v419_v6  ;;  %v96_v7 = vld [vmem:[%s612_s4 + $0x18] sm:$0xff]  ;;  %372 = vset.pattern.permute.xlu1 %v419_v6 }
   0x2   :  { %v470_v2 = vld [vmem:[%s608_s0] sm:$0xf]  ;;  %v108_v3 = vsel %vm101_vm0, %v460_v0, -inf  ;;  %v102_v4 = vsel %vm101_vm0, %v465_v1, -inf  ;;  %v484_v8 = vld [vmem:[%s612_s4 + $0x8] sm:$0xff]  ;;  %370 = vset.pattern.permute.xlu2 %v419_v6 }
   0x3   :  { %v273_v5 = vsel %vm272_vm1, %v470_v2, -inf  ;;  %109 = vmax.xlane.f32.xlu1 %v108_v3  ;;  %103 = vmax.xlane.f32.xlu0 %v102_v4 }
   0x4   :  { %274 = vmax.xlane.f32.xlu2 %v273_v5 }
   0x5   :  { %11 = vsyncpa [#allocation3], 0  ;;  %v111_v9 = vsel %vm101_vm0, %v96_v7, -inf  ;;  %v105_v10 = vsel %vm101_vm0, %v484_v8, -inf  ;;  %v492_v11 = vld [vmem:[%s613_s5] sm:$0xff]  ;;  %v497_v12 = vld [vmem:[%s613_s5 + $0x8] sm:$0xff]  ;;  %v150_v28 = vlaneseq }
   0x6   :  { %v504_v13 = vld [vmem:[%s613_s5 + $0x10] sm:$0xff]  ;;  %v509_v14 = vld [vmem:[%s613_s5 + $0x18] sm:$0xff]  ;;  %v271_v15 = vld [vmem:[%s609_s1] sm:$0xf]  ;;  %vm205_vm7 = vcmp.ne.s32.totalorder %v497_v12, 0  ;;  %vm204_vm8 = vcmp.ne.s32.totalorder %v492_v11, 0 }
   0x7   :  { %v536_v35 = vand.u32 127, %v150_v28  ;;  %v420_v58 = vmov 0.0   ;;  %vm206_vm9 = vcmp.ne.s32.totalorder %v504_v13, 0  ;;  %vm216_vm10 = vcmask 7168   ;;  %s338_s20 = sshll.u32 %s614_s6, 4  ;;  %s421_s22 = smov [#allocation2]   ;;  %s339_s20 = int_to_ptr.hbm [resolvable:$true] %s338_s20 }
   0x8   :  { %v234_v59 = vsel %vm205_vm7, 1.0, %v420_v58  ;;  %v233_v60 = vsel %vm204_vm8, 1.0, %v420_v58  ;;  %v235_v63 = vsel %vm206_vm9, 1.0, %v420_v58  ;;  %vm207_vm11 = vcmp.ne.s32.totalorder %v509_v14, 0  ;;  %s336_s23 = sshll.u32 %s421_s22, 4  ;;  %s337_s23 = int_to_ptr.vmem [resolvable:$true] %s336_s23 }
   0x9   :  { %v238_v61 = vsel %vm216_vm10, %v234_v59, 0.0  ;;  %v237_v62 = vsel %vm216_vm10, %v233_v60, 0.0  ;;  %vm309_vm12 = vcmask 24576   ;;  %vm294_vm13 = vcmask 3072  }
   0xa   :  { %vm254_vm15 = vcmp.eq.s32.totalorder %v536_v35, 0 }
   0xb   :  { %112 = vmax.xlane.f32.xlu1 %v111_v9  ;;  %106 = vmax.xlane.f32.xlu0 %v105_v10 }
  0x1c   :  { %153 = vperm.xlu2 %370, %v492_v11  }
  0x1f   :  { %156 = vperm.xlu0 %371, %v497_v12   ;;  %v305_v12 = vld [vmem:[%s610_s2] sm:$0x1] }
  0x24   :  { %159 = vperm.xlu1 %372, %v504_v13   ;;  %162 = vperm.xlu2 %370, %v509_v14  }
  0x2c   :  { %286 = vperm.xlu2 %370, %v271_v15  }
  0x76   :  { %v516_v16 = vpop.xlane.xlu1 %109  ;;  %v518_v17 = vpop.xlane.xlu0 %103 }
  0x77   :  { %v116_v18 = vsub.f32 %v460_v0, %v516_v16  ;;  %v114_v19 = vsub.f32 %v465_v1, %v518_v17  ;;  %v524_v20 = vpop.xlane.xlu2 %274 }
  0x78   :  { %v276_v42 = vsub.f32 %v470_v2, %v524_v20 }
  0x79   :  { %v122_v21 = vmul.f32 1.442695, %v116_v18  ;;  %v118_v22 = vmul.f32 1.442695, %v114_v19 }
  0x7a   :  { %v277_v45 = vmul.f32 1.442695, %v276_v42 }
  0x7b   :  { %373 = vpow2.f32 %v122_v21 }
  0x7c   :  { %375 = vpow2.f32 %v118_v22 }
  0x7e   :  { %v526_v23 = vpop.xlane.xlu1 %112  ;;  %v528_v24 = vpop.xlane.xlu0 %106 }
  0x7f   :  { %v117_v25 = vsub.f32 %v96_v7, %v526_v23  ;;  %v115_v26 = vsub.f32 %v484_v8, %v528_v24  ;;  %v154_v27 = vpop.permute.xlu2 %153 }
  0x80   :  { %vm164_vm3 = vcmp.eq.s32.totalorder %v536_v35, %v154_v27 }
  0x81   :  { %v374_v29 = vpop.eup %373  ;;  %v124_v30 = vmul.f32 1.442695, %v117_v25  ;;  %v120_v31 = vmul.f32 1.442695, %v115_v26  ;;  %v168_v44 = vsel %vm164_vm3, %v465_v1, 0.0  ;;  %v240_v1 = vsel %vm216_vm10, %v235_v63, 0.0 }
  0x82   :  { %v376_v32 = vpop.eup %375  ;;  %v132_v33 = vsel %vm101_vm0, %v374_v29, 0.0  ;;  %v172_v47 = vsel %vm101_vm0, %v168_v44, 0.0  ;;  %vm320_vm3 = vcmp.eq.s32.totalorder %v536_v35, 2 }
  0x83   :  { %377 = vpow2.f32 %v124_v30  ;;  %133 = vadd.xlane.f32.xlu0 %v132_v33  ;;  %v126_v34 = vsel %vm101_vm0, %v376_v32, 0.0 }
  0x84   :  { %379 = vpow2.f32 %v120_v31  ;;  %127 = vadd.xlane.f32.xlu1 %v126_v34 }
  0x85   :  { %381 = vpow2.f32 %v277_v45 }
  0x87   :  { %v163_v36 = vpop.permute.xlu2 %162 }
  0x88   :  { %vm167_vm2 = vcmp.eq.s32.totalorder %v536_v35, %v163_v36 }
  0x89   :  { %v378_v37 = vpop.eup %377  ;;  %v171_v38 = vsel %vm167_vm2, %v96_v7, 0.0 }
  0x8a   :  { %v380_v39 = vpop.eup %379  ;;  %v135_v40 = vsel %vm101_vm0, %v378_v37, 0.0  ;;  %v181_v41 = vsel %vm101_vm0, %v171_v38, 0.0 }
  0x8b   :  { %v129_v43 = vsel %vm101_vm0, %v380_v39, 0.0  ;;  %182 = vadd.xlane.f32.xlu0 %v181_v41  ;;  %v382_v52 = vpop.eup %381 }
  0x8c   :  { %136 = vadd.xlane.f32.xlu1 %v135_v40  ;;  %130 = vadd.xlane.f32.xlu2 %v129_v43  ;;  %v279_v55 = vsel %vm272_vm1, %v382_v52, 0.0 }
  0x8f   :  { %v287_v54 = vpop.permute.xlu2 %286 }
  0x90   :  { %vm288_vm6 = vcmp.eq.s32.totalorder %v536_v35, %v287_v54 }
  0x91   :  { %v157_v46 = vpop.permute.xlu0 %156  ;;  %v289_v56 = vsel %vm288_vm6, %v470_v2, 0.0  ;;  %v236_v2 = vsel %vm207_vm11, 1.0, %v420_v58 }
  0x92   :  { %vm165_vm4 = vcmp.eq.s32.totalorder %v536_v35, %v157_v46  ;;  %v290_v57 = vsel %vm272_vm1, %v289_v56, 0.0  ;;  %v242_v5 = vsel %vm216_vm10, %v236_v2, 0.0  ;;  %vm258_vm1 = vcmp.eq.s32.totalorder %v536_v35, 1 }
  0x93   :  { %v169_v48 = vsel %vm165_vm4, %v484_v8, 0.0  ;;  %vm324_vm4 = vcmp.eq.s32.totalorder %v536_v35, 3 }
  0x94   :  { %173 = vadd.xlane.f32.xlu2 %v172_v47  ;;  %v175_v49 = vsel %vm101_vm0, %v169_v48, 0.0 }
  0x95   :  { %176 = vadd.xlane.f32.xlu1 %v175_v49 }
  0x96   :  { %v160_v50 = vpop.permute.xlu1 %159 }
  0x97   :  { %vm166_vm5 = vcmp.eq.s32.totalorder %v536_v35, %v160_v50 }
  0x98   :  { %v170_v51 = vsel %vm166_vm5, %v460_v0, 0.0  ;;  %v239_v0 = vadd.f32 %v238_v61, %v237_v62 }
  0x99   :  { %v178_v53 = vsel %vm101_vm0, %v170_v51, 0.0 }
  0x9a   :  { %v241_v3 = vadd.f32 %v240_v1, %v239_v0 }
  0x9c   :  { %179 = vadd.xlane.f32.xlu2 %v178_v53  ;;  %v243_v6 = vadd.f32 %v242_v5, %v241_v3 }
  0x9d   :  { %280 = vadd.xlane.f32.xlu1 %v279_v55 }
  0xa4   :  { %291 = vadd.xlane.f32.xlu2 %v290_v57 }
  0xa5   :  { %244 = vadd.xlane.f32.xlu1 %v243_v6 }
  0xf6   :  { %v134_v7 = vpop.xlane.xlu0 %133 }
  0xf7   :  { %v128_v4 = vpop.xlane.xlu1 %127 }
  0xf8   :  { %383 = vlog2.f32 %v128_v4 }
  0xf9   :  { %385 = vlog2.f32 %v134_v7 }
  0xfe   :  { %v384_v8 = vpop.eup %383  ;;  %v183_v37 = vpop.xlane.xlu0 %182 }
  0xff   :  { %v137_v9 = vpop.xlane.xlu1 %136  ;;  %v131_v10 = vpop.xlane.xlu2 %130  ;;  %v139_v15 = vmul.f32 0.6931472, %v384_v8 }
 0x100   :  { %387 = vlog2.f32 %v137_v9  ;;  %v386_v18 = vpop.eup %385 }
 0x101   :  { %389 = vlog2.f32 %v131_v10  ;;  %v146_v21 = vadd.f32 %v139_v15, %v518_v17  ;;  %v143_v31 = vmul.f32 0.6931472, %v386_v18 }
 0x103   :  { %v148_v39 = vadd.f32 %v143_v31, %v516_v16  ;;  %v306_v16 = vld [vmem:[%s611_s3] sm:$0x1] }
 0x104   :  { %v307_v48 = vsub.f32 %v305_v12, %v306_v16 }
 0x106   :  { %v388_v19 = vpop.eup %387  ;;  %v308_v13 = vmul.f32 %v307_v48, %v307_v48 }
 0x107   :  { %v390_v22 = vpop.eup %389  ;;  %v145_v25 = vmul.f32 0.6931472, %v388_v19  ;;  %v174_v26 = vpop.xlane.xlu2 %173 }
 0x108   :  { %v141_v27 = vmul.f32 0.6931472, %v390_v22  ;;  %v184_v29 = vsub.f32 %v146_v21, %v174_v26  ;;  %v177_v30 = vpop.xlane.xlu1 %176  ;;  %v310_v54 = vsel %vm309_vm12, %v308_v13, 0.0 }
 0x109   :  { %v149_v32 = vadd.f32 %v145_v25, %v526_v23 }
 0x10a   :  { %v147_v33 = vadd.f32 %v141_v27, %v528_v24  ;;  %v212_v34 = vsel %vm204_vm8, %v184_v29, 0.0  ;;  %v191_v29 = vshrl.u32 %v150_v28, 7 }
 0x10b   :  { %v187_v38 = vsub.f32 %v149_v32, %v183_v37  ;;  %v217_v40 = vsel %vm216_vm10, %v212_v34, 0.0 }
 0x10c   :  { %v185_v36 = vsub.f32 %v147_v33, %v177_v30  ;;  %vm253_vm14 = vcmp.eq.s32.totalorder %v191_v29, 0 }
 0x10d   :  { %v215_v11 = vsel %vm207_vm11, %v187_v38, 0.0  ;;  %vm255_vm0 = vmand %vm253_vm14, %vm254_vm15 }
 0x10e   :  { %v213_v17 = vsel %vm205_vm7, %v185_v36, 0.0  ;;  %v222_v47 = vsel %vm216_vm10, %v215_v11, 0.0  ;;  %vm259_vm2 = vmand %vm253_vm14, %vm258_vm1 }
 0x10f   :  { %v218_v41 = vsel %vm216_vm10, %v213_v17, 0.0  ;;  %v180_v42 = vpop.xlane.xlu2 %179  ;;  %vm321_vm5 = vmand %vm253_vm14, %vm320_vm3 }
 0x110   :  { %v219_v43 = vadd.f32 %v218_v41, %v217_v40  ;;  %v186_v23 = vsub.f32 %v148_v39, %v180_v42  ;;  %v281_v44 = vpop.xlane.xlu1 %280  ;;  %vm325_vm6 = vmand %vm253_vm14, %vm324_vm4 }
 0x111   :  { %391 = vlog2.f32 %v281_v44 }
 0x112   :  { %v214_v24 = vsel %vm206_vm9, %v186_v23, 0.0 }
 0x113   :  { %v220_v45 = vsel %vm216_vm10, %v214_v24, 0.0 }
 0x114   :  { %v221_v46 = vadd.f32 %v220_v45, %v219_v43 }
 0x116   :  { %v223_v49 = vadd.f32 %v222_v47, %v221_v46 }
 0x117   :  { %v392_v14 = vpop.eup %391  ;;  %v292_v52 = vpop.xlane.xlu2 %291 }
 0x118   :  { %v283_v50 = vmul.f32 0.6931472, %v392_v14  ;;  %224 = vadd.xlane.f32.xlu0 %v223_v49  ;;  %v245_v56 = vpop.xlane.xlu1 %244 }
 0x119   :  { %v246_v57 = vrot.slane %v245_v56, 4 }
 0x11a   :  { %v284_v51 = vadd.f32 %v283_v50, %v524_v20 }
 0x11b   :  { %v247_v58 = vadd.f32 %v246_v57, %v245_v56 }
 0x11c   :  { %v293_v53 = vsub.f32 %v284_v51, %v292_v52 }
 0x11d   :  { %v248_v59 = vrot.slane %v247_v58, 2 }
 0x11e   :  { %v295_v55 = vsel %vm294_vm13, %v293_v53, 0.0 }
 0x11f   :  { %296 = vadd.xlane.f32.xlu2 %v295_v55  ;;  %v249_v62 = vadd.f32 %v248_v59, %v247_v58 }
 0x120   :  { %311 = vadd.xlane.f32.xlu0 %v310_v54 }
 0x121   :  { %v250_v1 = vrot.slane %v249_v62, 1 }
 0x123   :  { %v251_v8 = vadd.f32 %v250_v1, %v249_v62 }
 0x18b   :  { %v225_v60 = vpop.xlane.xlu0 %224 }
 0x18c   :  { %v226_v61 = vrot.slane %v225_v60, 4 }
 0x18e   :  { %v227_v63 = vadd.f32 %v226_v61, %v225_v60 }
 0x190   :  { %v228_v0 = vrot.slane %v227_v63, 2 }
 0x192   :  { %v297_v2 = vpop.xlane.xlu2 %296  ;;  %v229_v20 = vadd.f32 %v228_v0, %v227_v63 }
 0x193   :  { %v298_v3 = vrot.slane %v297_v2, 4  ;;  %v312_v4 = vpop.xlane.xlu0 %311 }
 0x194   :  { %v313_v5 = vrot.slane %v312_v4, 4  ;;  %v230_v6 = vrot.slane %v229_v20, 1 }
 0x195   :  { %v299_v7 = vadd.f32 %v298_v3, %v297_v2 }
 0x196   :  { %v314_v9 = vadd.f32 %v313_v5, %v312_v4  ;;  %v231_v10 = vadd.f32 %v230_v6, %v229_v20 }
 0x197   :  { %v300_v15 = vrot.slane %v299_v7, 2 }
 0x198   :  { %v315_v18 = vrot.slane %v314_v9, 2  ;;  %359 = vpush %v231_v10 }
 0x199   :  { %v301_v19 = vadd.f32 %v300_v15, %v299_v7  ;;  %361 = vpush %v251_v8 }
 0x19a   :  { %v316_v21 = vadd.f32 %v315_v18, %v314_v9 }
 0x19b   :  { %v302_v22 = vrot.slane %v301_v19, 1 }
 0x19c   :  { %v317_v25 = vrot.slane %v316_v21, 1 }
 0x19d   :  { %v303_v26 = vadd.f32 %v302_v22, %v301_v19 }
 0x19e   :  { %v318_v27 = vadd.f32 %v317_v25, %v316_v21 }
 0x19f   :  { %363 = vpush %v303_v26 }
 0x1a0   :  { %365 = vpush %v318_v27 }
 0x1c9   :  { %s360_s2 = spop %359 }
 0x1ca   :  { %v256_v30 = vstv %s360_s2  ;;  %s362_s3 = spop %361 }
 0x1cb   :  { %v257_v31 = vsel %vm255_vm0, %v256_v30, 0.0  ;;  %v260_v32 = vstv %s362_s3 }
 0x1cc   :  { %v261_v33 = vsel %vm259_vm2, %v260_v32, %v257_v31 }
 0x1d0   :  { %s364_s17 = spop %363 }
 0x1d1   :  { %v322_v28 = vstv %s364_s17  ;;  %s366_s21 = spop %365 }
 0x1d2   :  { %v323_v34 = vsel %vm321_vm5, %v322_v28, 0.0  ;;  %v326_v36 = vstv %s366_s21 }
 0x1d3   :  { %v327_v37 = vsel %vm325_vm6, %v326_v36, %v323_v34 }
 0x1d4   :  { %v329_v38 = vadd.f32 %v327_v37, %v261_v33 }
 0x1d6   :  { %330 = vst [vmem:[#allocation2] sm:$0xff] %v329_v38 }
 0x1d7   :  { %341 = dma.vmem_to_hbm [thread:$0]  %s337_s23, 128, %s339_s20, [#allocation3]  }
 0x1d8   :  { %417 = dma.done.wait [#allocation3], 128  }
 0x1d9   :  { %418 = vsyncadd [#allocation3], 4294967168 }
 0x1da   :  { %346 = vsyncpa [#allocation3], 1 }

</bundles_post_ra>
